<compile_context>
chip_gen: v7x
topology: tpu7x:2x2x1
jax: 0.10.0
libtpu: 0.0.40
codegen_flags: <defaults>
</compile_context>

<pallas_src>
import jax
import jax.numpy as jnp
from jax.experimental import pallas as pl
from jax.experimental.pallas import tpu as pltpu


def _round_up(x, m):
    return ((x + m - 1) // m) * m


def _time_encode_kernel_bias(t_ref, wb_ref, o_ref):
    t = t_ref[...]                 # (tm, 1)   one time value per row
    w = wb_ref[0:1, :]             # (1, dim)  weight row
    b = wb_ref[1:2, :]             # (1, dim)  bias row
    # Broadcast outer product + bias, then cosine: pure VPU/EUP elementwise.
    o_ref[...] = jnp.cos(t * w + b).astype(o_ref.dtype)


def _time_encode_kernel_nobias(t_ref, w_ref, o_ref):
    t = t_ref[...]                 # (tm, 1)
    w = w_ref[0:1, :]              # (1, dim)
    o_ref[...] = jnp.cos(t * w).astype(o_ref.dtype)


def time_encode(t, weight, bias=None, *, tm=8192, out_dtype=jnp.float32):
    """TimeEncode forward.

    t      : any shape; flattened to (N, 1).
    weight : (dim, 1) float32.
    bias   : (dim,) float32 or None (None -> bias add elided, matches the
             zero-initialised bias of the PyTorch module).
    Returns (N, dim) in `out_dtype` (default float32, matching PyTorch).
    """
    t_flat = t.reshape(-1, 1).astype(jnp.float32)        # (N, 1)
    N = t_flat.shape[0]
    dim = int(weight.shape[0])

    # ---- Row tile sizing ---------------------------------------------------
    #  * output tile capped at ~8 MiB (amortise per-step overhead, fit VMEM)
    #  * >= 2 grid steps when N allows it (v7x dual-TC sharding)
    #  * multiple of 8 (sublane); ragged last block handled by cdiv grid.
    dim_lanes = _round_up(dim, 128)                      # VMEM lane padding
    out_bytes_per_row = dim_lanes * 4
    tm_eff = min(tm, max(8, (8 << 20) // out_bytes_per_row))
    if N >= 16:
        tm_eff = min(tm_eff, _round_up(pl.cdiv(N, 2), 8))   # >= 2 grid steps
    tm_eff = max(8, _round_up(min(tm_eff, _round_up(N, 8)), 8))
    grid = (pl.cdiv(N, tm_eff),)

    # ---- Parameter stream ----------------------------------------------------
    w_row = weight.reshape(1, dim).astype(jnp.float32)
    if bias is None:
        wb = w_row                                        # (1, dim)
        kernel = _time_encode_kernel_nobias
    else:
        b_row = bias.reshape(1, dim).astype(jnp.float32)
        wb = jnp.concatenate([w_row, b_row], axis=0)      # (2, dim)
        kernel = _time_encode_kernel_bias
    wb_rows = wb.shape[0]

    # ---- VMEM budget ---------------------------------------------------------
    out_elt = jnp.dtype(out_dtype).itemsize
    block_bytes = (
        2 * tm_eff * dim_lanes * out_elt        # output double-buffer
        + 2 * tm_eff * 128 * 4                  # (tm,1) t block is lane-padded
        + 2 * _round_up(wb_rows, 8) * dim_lanes * 4   # weight/bias stream
    )
    # Cap well below v7x's 64 MiB per-TC VMEM to leave compiler headroom.
    vmem_limit = int(min(max(2 * block_bytes, 16 << 20), 48 << 20))

    out = pl.pallas_call(
        kernel,
        out_shape=jax.ShapeDtypeStruct((N, dim), out_dtype),
        grid=grid,
        in_specs=[
            pl.BlockSpec((tm_eff, 1), lambda i: (i, 0)),        # time rows
            pl.BlockSpec((wb_rows, dim), lambda i: (0, 0)),     # [weight; bias]
        ],
        out_specs=pl.BlockSpec((tm_eff, dim), lambda i: (i, 0)),
        compiler_params=pltpu.CompilerParams(
            dimension_semantics=("parallel",),
            vmem_limit_bytes=vmem_limit,
        ),
        cost_estimate=pl.CostEstimate(
            flops=2 * N * dim,
            transcendentals=N * dim,
            bytes_accessed=4 * (N + 2 * dim) + N * dim * out_elt,
        ),
    )(t_flat, wb)

    return out


def make_time_encode_params(dim):
    """Deterministic parameter init matching TimeEncode.__init__."""
    weight = (1.0 / (10.0 ** jnp.linspace(0.0, 9.0, dim))).reshape(dim, 1)
    weight = weight.astype(jnp.float32)
    bias = jnp.zeros((dim,), dtype=jnp.float32)
    return weight, bias


if __name__ == "__main__":
    key = jax.random.PRNGKey(0)
    k1, k2 = jax.random.split(key)

    # Case 1: aligned dim (128) -> lane-dense unmasked stores, 2 grid steps.
    dim = 128
    batch, seq = 2, 64
    # NOTE: callers with unix-epoch-scale timestamps should pre-shift/normalize
    # t; f32 cosine argument reduction loses precision for |t*w| >> 1e6.
    t = jax.random.uniform(k1, (batch, seq), dtype=jnp.float32) * 100.0
    weight, bias = make_time_encode_params(dim)

    out = jax.block_until_ready(time_encode(t, weight, bias))
    ref = jnp.cos(t.reshape(-1, 1) @ weight.T + bias[None, :])
    assert out.shape == (batch * seq, dim)
    assert jnp.allclose(out, ref, atol=1e-5, rtol=1e-5), "mismatch (aligned)"

    # Case 1b: bias elided (bias is identically zero at init in this module).
    out_nb = jax.block_until_ready(time_encode(t, weight, None))
    assert jnp.allclose(out_nb, ref, atol=1e-5, rtol=1e-5), "mismatch (no-bias)"

    # Case 2: unaligned dim and N -> ragged last block + masked lane stores,
    # no wrapper-side padding or post-kernel slice.
    dim2 = 100
    t2 = jax.random.uniform(k2, (3, 23), dtype=jnp.float32) * 100.0
    w2, b2 = make_time_encode_params(dim2)

    out2 = jax.block_until_ready(time_encode(t2, w2, b2))
    ref2 = jnp.cos(t2.reshape(-1, 1) @ w2.T + b2[None, :])
    assert out2.shape == (3 * 23, dim2)
    assert jnp.allclose(out2, ref2, atol=1e-5, rtol=1e-5), "mismatch (ragged)"

    print("KERNEL_OK")
</pallas_src>

<mosaic_0001>
module attributes {stable_mosaic.version = 11 : i64} {
  func.func @_time_encode_kernel_bias(%arg0: i32, %arg1: memref<64x1xf32, #tpu.memory_space<vmem>>, %arg2: memref<2x128xf32, #tpu.memory_space<vmem>>, %arg3: memref<64x128xf32, #tpu.memory_space<vmem>>) attributes {dimension_semantics = [#tpu.dimension_semantics<parallel>], iteration_bounds = array<i64: 2>, scalar_prefetch = 0 : i64, scratch_operands = 0 : i64, tpu.core_type = #tpu.core_type<tc>, window_params = [{transform_indices = @transform_0, window_bounds = array<i64: 64, 1>}, {pipeline_mode = #tpu.pipeline_mode<synchronous>, transform_indices = @transform_1, window_bounds = array<i64: 2, 128>}, {transform_indices = @transform_2, window_bounds = array<i64: 64, 128>}]} {
    %c0 = arith.constant 0 : index
    %c0_0 = arith.constant 0 : index
    %0 = vector.load %arg1[%c0, %c0_0] : memref<64x1xf32, #tpu.memory_space<vmem>>, vector<64x1xf32>
    %c0_1 = arith.constant 0 : index
    %c0_2 = arith.constant 0 : index
    %1 = vector.load %arg2[%c0_1, %c0_2] : memref<2x128xf32, #tpu.memory_space<vmem>>, vector<1x128xf32>
    %c1 = arith.constant 1 : index
    %c0_3 = arith.constant 0 : index
    %2 = vector.load %arg2[%c1, %c0_3] : memref<2x128xf32, #tpu.memory_space<vmem>>, vector<1x128xf32>
    %3 = vector.broadcast %0 : vector<64x1xf32> to vector<64x128xf32>
    %4 = vector.broadcast %1 : vector<1x128xf32> to vector<64x128xf32>
    %5 = arith.mulf %3, %4 : vector<64x128xf32>
    %6 = vector.broadcast %2 : vector<1x128xf32> to vector<64x128xf32>
    %7 = arith.addf %5, %6 : vector<64x128xf32>
    %8 = math.cos %7 : vector<64x128xf32>
    %c0_4 = arith.constant 0 : index
    %c0_5 = arith.constant 0 : index
    %9 = vector.load %arg3[%c0_4, %c0_5] : memref<64x128xf32, #tpu.memory_space<vmem>>, vector<64x128xf32>
    tpu.vector_store %arg3[%c0_4, %c0_5], %8 {strides = array<i32>} : memref<64x128xf32, #tpu.memory_space<vmem>>, vector<64x128xf32>,
    return
  }
  func.func @transform_0(%arg0: i32) -> (i32, i32) {
    %c0_i32 = arith.constant 0 : i32
    %c0_i32_0 = arith.constant 0 : i32
    return %arg0, %c0_i32 : i32, i32
  }
  func.func @transform_1(%arg0: i32) -> (i32, i32) {
    %c0_i32 = arith.constant 0 : i32
    %c0_i32_0 = arith.constant 0 : i32
    %c0_i32_1 = arith.constant 0 : i32
    return %c0_i32, %c0_i32_0 : i32, i32
  }
  func.func @transform_2(%arg0: i32) -> (i32, i32) {
    %c0_i32 = arith.constant 0 : i32
    %c0_i32_0 = arith.constant 0 : i32
    return %arg0, %c0_i32 : i32, i32
  }
}

</mosaic_0001>

<bundles_post_ra>
// kernel: tpu_custom_call.1
= control target key start
LH: loop header
LB: loop body
LE: loop exit
PB: predicated region body
PF: predicated region fallthrough
CT: control target
= control target key end

     0   :  { %7 = vsyncpa [#allocation3], 0  ;;  %s2083_s0 = inlined_call_operand.vmem [shape: f32[128,1], index: 0, kind: input, shape index: {}]   ;;  %s2084_s1 = inlined_call_operand.vmem [shape: f32[2,128], index: 1, kind: input, shape index: {}]   ;;  %s2085_s2 = inlined_call_operand.hbm [shape: f32[128,128], index: 2, kind: output, shape index: {}]  }
   0x1   :  { %9 = vsyncpa [#allocation3 + $0x1], 0  ;;  %s1379_s9 = smov 0   ;;  %s1381_s10 = smov 0  }
   0x2   :  { %s1383_s11 = smov 0   ;;  %s1385_s12 = smov 0  }
   0x3 LB: > { %s1400_s13 = sadd.s32 4294967295, %s1352_s12   ;;  %s1127_s14 = sadd.s32 4294967294, %s1352_s12   ;;  %s1352_s12 = sphi %s1385_s12, %s2103_s12   ;;  %s1348_s11 = sphi %s1383_s11, %s2102_s11   ;;  %s1344_s10 = sphi %s1381_s10, %s2101_s10   ;;  %s1340_s9 = sphi %s1379_s9, %s2100_s9  }
   0x4   : > { %s1404_s15 = sadd.s32 1, %s1352_s12   ;;  %s69_s16 = sadd.s32 1, %s1348_s11 }
   0x5   : > { %s66_s17 = ssub.s32 %s1352_s12, %s1404_s15  ;;  %p79_p0 = scmp.ne.s32.totalorder %s1348_s11, %s1344_s10 }
   0x6   : > { %p67_p1 = scmp.eq.s32.totalorder %s66_s17, 0  ;;  %p80_p2 = scmp.eq.s32.totalorder %s1400_s13, 1 }
   0x7   : > { %p85_p3 = scmp.ne.s32.totalorder %s1344_s10, %s1340_s9  ;;  %p86_p4 = scmp.eq.s32.totalorder %s1127_s14, 1 }
   0x8   : > { %s1415_s18 = scalar_select %p67_p1, %s1348_s11, %s69_s16  }
   0x9   : > { %p1417_p5 = por %p80_p2, %p79_p0  ;;  %p1421_p6 = por %p86_p4, %p85_p3 }
   0xa   : > { %p1130_p7 = scmp.ge.s32.totalorder %s1352_s12, 1  ;;  %p116_p8 = scmp.lt.s32.totalorder %s1352_s12, 3 }
   0xc   : > { %p117_p9 = pnand %p1130_p7, %p116_p8 }
   0xd   : > { %s1132_s21 = sshll.u32 (!%p117_p9), %s1400_s13, 3  ;;  %v1354_v0 = vmov (!%p117_p9), 0   ;;  %v1434_v9 = vld [vmem:[%s2084_s1] ss:$0 sm:$0xff] (!%p117_p9)  ;;  %v1439_v10 = vld [vmem:[%s2084_s1 + $0x1] ss:$0 sm:$0xff] (!%p117_p9) }
   0xe   : > { %120 = sbr.rel (%p117_p9) target bundleno = 408 (0x198), region = 28  ;;  %1255 = vset.pattern.permute.xlu1 (!%p117_p9), %v1354_v0  ;;  %1254 = vset.pattern.permute.xlu0 (!%p117_p9), %v1354_v0  ;;  %p139_p10 = scmp.lt.s32.totalorder (!%p117_p9), %s1132_s21, 15  ;;  %v1355_v47 = vmov (!%p117_p9), 683565275   ;;  %v1356_v51 = vmov (!%p117_p9), 2475754826  }
   0xf   : > { %v1357_v53 = vmov (!%p117_p9), 2131351028   ;;  %v1358_v55 = vmov (!%p117_p9), 2102212464   ;;  %v1359_v57 = vmov (!%p117_p9), 920167782  }
  0x10   : > { %v1360_v0 = vmov (!%p117_p9), 1326507024   ;;  %s135_s30 = sand.u32 (!%p117_p9), 1, %s1344_s10   ;;  %s1173_s14 = sshll.u32 (!%p117_p9), %s1400_s13, 10 }
  0x11   : > { %s1131_s3 = sshll.u32 (!%p117_p9), %s135_s30, 6  ;;  %s2042_s13 = scalar_lea.sflag (!%p117_p9), [#allocation3], %s135_s30 }
  0x12   : > { %s1717_s4 = scalar_lea.vmem (!%p117_p9), [#allocation2], %s1131_s3  ;;  %s1361_s24 = smov (!%p117_p9), [#allocation2]  }
  0x13   : > { %s1065_s16 = sshll.u32 (!%p117_p9), %s1717_s4, 4  ;;  %s2036_s16 = int_to_ptr.vmem [resolvable:$true] %s1065_s16 }
  0x14   : > { %s1290_s23 = scalar_lea.vmem (!%p117_p9), %s2036_s16, 1024 }
  0x15   : > { %s2105_s21 = smov (!%p139_p10, %s1132_s21), 15  ;;  %p1291_p11 = scmp.ne.s32.totalorder %s2036_s16, %s1290_s23 }
  0x16   : > { %s1133_s22 = sshll.u32 %s2105_s21, 3 }
  0x17   : > { %s142_s25 = scalar_lea.vmem %s2083_s0, %s1133_s22  ;;  %s2034_s22 = scalar_lea.hbm %s2085_s2, %s1173_s14 }
  0x18   : > { %v147_v1 = vld [vmem:[%s142_s25 + $0x10] sm:$0xff]  ;;  %v145_v2 = vld [vmem:[%s142_s25] sm:$0xff]  ;;  %v148_v3 = vld [vmem:[%s142_s25 + $0x18] sm:$0xff]  ;;  %p1292_p12 = pnand %p1291_p11, %p1417_p5 }
  0x19   : > { %167 = vperm.xlu1 %1255, %v147_v1   ;;  %157 = vperm.xlu0 %1254, %v145_v2   ;;  %v146_v4 = vld [vmem:[%s142_s25 + $0x8] sm:$0xff]  ;;  %v149_v6 = vld [vmem:[%s142_s25 + $0x20] sm:$0xff]  ;;  %v152_v7 = vld [vmem:[%s142_s25 + $0x38] sm:$0xff] }
  0x1a   : > { %v150_v5 = vld [vmem:[%s142_s25 + $0x28] sm:$0xff]  ;;  %v151_v8 = vld [vmem:[%s142_s25 + $0x30] sm:$0xff]  ;;  %p1293_p13 = pneg %p1292_p12  ;;  %s1294_s25 = sshll.u32 %s1361_s24, 4  ;;  %s1295_s25 = int_to_ptr.vmem [resolvable:$false] %s1294_s25 }
  0x1b   : > { %s1296_s26 = scalar_lea.vmem %s1295_s25, 2048  ;;  %p1297_p0 = scmp.lt.s32.totalorder %s2036_s16, %s1295_s25 }
  0x1c   : > { %p1298_p1 = scmp.lt.s32.totalorder %s1296_s26, %s1290_s23 }
  0x1d   : > { %172 = vperm.xlu1 %1255, %v148_v3   ;;  %162 = vperm.xlu0 %1254, %v146_v4  }
  0x1e   : > { %p1299_p2 = por %p1298_p1, %p1297_p0 }
  0x20   : > { %p1300_p3 = pnand %p1299_p2, %p1293_p13 }
  0x21   : > { %182 = vperm.xlu1 %1255, %v150_v5   ;;  %177 = vperm.xlu0 %1254, %v149_v6  }
  0x25   : > { %192 = vperm.xlu1 %1255, %v152_v7   ;;  %187 = vperm.xlu0 %1254, %v151_v8  }
  0x98   : > { %v168_v11 = vpop.permute.xlu1 %167  ;;  %v158_v12 = vpop.permute.xlu0 %157 }
  0x99   : > { %v201_v13 = vmul.f32 %v1434_v9, %v168_v11  ;;  %v199_v14 = vmul.f32 %v1434_v9, %v158_v12 }
  0x9b   : > { %v1444_v15 = vadd.f32 %v1439_v10, %v201_v13  ;;  %v1447_v16 = vadd.f32 %v1439_v10, %v199_v14 }
  0x9c   : > { %v173_v17 = vpop.permute.xlu1 %172  ;;  %v163_v35 = vpop.permute.xlu0 %162 }
  0x9d   : > { %v425_v18 = vand.u32 2147483647, %v1444_v15  ;;  %v428_v19 = vand.u32 2139095040, %v1444_v15  ;;  %v219_v20 = vand.u32 2147483647, %v1447_v16  ;;  %v222_v21 = vand.u32 2139095040, %v1447_v16 }
  0x9e   : > { %v202_v23 = vmul.f32 %v1434_v9, %v173_v17  ;;  %v1463_v41 = vmul.f32 %v1434_v9, %v163_v35  ;;  %vm427_vm14 = vcmp.lt.s32.totalorder %v1444_v15, 0 }
  0x9f   : > { %v429_v22 = vshrl.u32 %v428_v19, 23  ;;  %v432_v24 = vand.u32 8388607, %v425_v18  ;;  %v223_v25 = vshrl.u32 %v222_v21, 23  ;;  %v226_v26 = vand.u32 8388607, %v219_v20 }
  0xa0   : > { %v1459_v28 = vadd.f32 %v1439_v10, %v202_v23 }
  0xa1   : > { %v1144_v27 = vadd.s32 4294967169, %v429_v22  ;;  %v1136_v29 = vadd.s32 4294967169, %v223_v25  ;;  %v433_v31 = vor.u32 8388608, %v432_v24  ;;  %v227_v32 = vor.u32 8388608, %v226_v26 }
  0xa2   : > { %v531_v34 = vand.u32 2139095040, %v1459_v28  ;;  %v528_v45 = vand.u32 2147483647, %v1459_v28 }
  0xa3   : > { %v435_v30 = vadd.s32 1, %v1144_v27  ;;  %v229_v33 = vadd.s32 1, %v1136_v29  ;;  %v1465_v42 = vshll.u32 %v433_v31, 8  ;;  %v1469_v44 = vshll.u32 %v227_v32, 8 }
  0xa4   : > { %v532_v37 = vshrl.u32 %v531_v34, 23 }
  0xa5   : > { %vm436_vm0 = vcmp.gt.s32.totalorder %v435_v30, 0  ;;  %vm230_vm1 = vcmp.gt.s32.totalorder %v229_v33, 0 }
  0xa6   : > { %v437_v36 = vsel %vm436_vm0, %v435_v30, 0  ;;  %v231_v40 = vsel %vm230_vm1, %v229_v33, 0  ;;  %v1473_v50 = vadd.s32 4294967169, %v532_v37 }
  0xa7   : > { %v438_v38 = vshrl.u32 %v437_v36, 5  ;;  %v439_v39 = vand.u32 31, %v437_v36  ;;  %v1467_v43 = vshrl.u32 %v231_v40, 5  ;;  %v233_v49 = vand.u32 31, %v231_v40 }
  0xa9   : > { %v440_v46 = vsub.s32 32, %v439_v39  ;;  %v442_v48 = vshll.u32 %v1355_v47, %v439_v39  ;;  %v445_v52 = vshll.u32 %v1356_v51, %v439_v39  ;;  %v448_v54 = vshll.u32 %v1357_v53, %v439_v39 }
  0xaa   : > { %v451_v56 = vshll.u32 %v1358_v55, %v439_v39  ;;  %v454_v58 = vshll.u32 %v1359_v57, %v439_v39  ;;  %vm457_vm2 = vcmp.lt.s32.totalorder %v438_v38, 1  ;;  %vm458_vm3 = vcmp.lt.s32.totalorder %v438_v38, 2 }
  0xab   : > { %v443_v59 = vshrl.u32 %v1356_v51, %v440_v46  ;;  %v446_v60 = vshrl.u32 %v1357_v53, %v440_v46  ;;  %v449_v61 = vshrl.u32 %v1358_v55, %v440_v46  ;;  %v441_v62 = vshrl.u32 %v1355_v47, %v440_v46 }
  0xac   : > { %v452_v63 = vshrl.u32 %v1359_v57, %v440_v46  ;;  %v455_v1 = vshrl.u32 %v1360_v0, %v440_v46  ;;  %v234_v5 = vsub.s32 32, %v233_v49  ;;  %vm459_vm4 = vcmp.lt.s32.totalorder %v438_v38, 3 }
  0xad   : > { %v444_v2 = vor.u32 %v443_v59, %v442_v48  ;;  %v447_v3 = vor.u32 %v446_v60, %v445_v52  ;;  %v450_v4 = vor.u32 %v449_v61, %v448_v54  ;;  %vm460_vm5 = vcmp.lt.s32.totalorder %v438_v38, 4 }
  0xae   : > { %v453_v6 = vor.u32 %v452_v63, %v451_v56  ;;  %v456_v7 = vor.u32 %v455_v1, %v454_v58  ;;  %v236_v21 = vshll.u32 %v1355_v47, %v233_v49  ;;  %v237_v24 = vshrl.u32 %v1356_v51, %v234_v5 }
  0xaf   : > { %v461_v8 = vsel %vm457_vm2, %v441_v62, %v444_v2  ;;  %v462_v11 = vsel %vm460_vm5, %v450_v4, 2102212464  ;;  %v465_v12 = vsel %vm457_vm2, %v444_v2, %v447_v3  ;;  %v469_v13 = vsel %vm457_vm2, %v447_v3, %v450_v4 }
  0xb0   : > { %v463_v14 = vsel %vm459_vm4, %v447_v3, %v462_v11  ;;  %v466_v17 = vsel %vm460_vm5, %v453_v6, 920167782  ;;  %v470_v19 = vsel %vm460_vm5, %v456_v7, 1326507024  ;;  %v239_v25 = vshll.u32 %v1356_v51, %v233_v49 }
  0xb1   : > { %v467_v22 = vsel %vm459_vm4, %v450_v4, %v466_v17  ;;  %v471_v23 = vsel %vm459_vm4, %v453_v6, %v470_v19  ;;  %v464_v26 = vsel %vm458_vm3, %v461_v8, %v463_v14  ;;  %v240_v30 = vshrl.u32 %v1357_v53, %v234_v5 }
  0xb2   : > { %v468_v27 = vsel %vm458_vm3, %v465_v12, %v467_v22  ;;  %v472_v29 = vsel %vm458_vm3, %v469_v13, %v471_v23  ;;  %v238_v35 = vor.u32 %v237_v24, %v236_v21  ;;  %v242_v37 = vshll.u32 %v1357_v53, %v233_v49 }
  0xb3   : > { %v1496_v31 = vmul.u32.u64.low %v1465_v42, %v472_v29  ;;  %v1497_v32 = vmul.u32.u64.high %v1465_v42, %v472_v29, %v1496_v31  ;;  %v1500_v33 = vmul.u32.u64.low %v1465_v42, %v468_v27  ;;  %v1501_v34 = vmul.u32.u64.high %v1465_v42, %v468_v27, %v1500_v33 }
  0xb4   : > { %v241_v36 = vor.u32 %v240_v30, %v239_v25  ;;  %v243_v39 = vshrl.u32 %v1358_v55, %v234_v5  ;;  %v235_v40 = vshrl.u32 %v1355_v47, %v234_v5  ;;  %v245_v38 = vshll.u32 %v1358_v55, %v233_v49 }
  0xb5   : > { %v246_v46 = vshrl.u32 %v1359_v57, %v234_v5  ;;  %v249_v48 = vshrl.u32 %v1360_v0, %v234_v5  ;;  %v480_v52 = vmul.u32 %v1465_v42, %v464_v26  ;;  %v248_v56 = vshll.u32 %v1359_v57, %v233_v49 }
  0xb6   : > { %v244_v54 = vor.u32 %v243_v39, %v242_v37  ;;  %vm251_vm6 = vcmp.lt.s32.totalorder %v1467_v43, 1  ;;  %vm482_vm7 = vc.u32 %v1497_v32, %v1500_v33  ;;  %v483_v58 = vadd.s32 1, %v1501_v34 }
  0xb7   : > { %v247_v59 = vor.u32 %v246_v46, %v245_v38  ;;  %vm252_vm8 = vcmp.lt.s32.totalorder %v1467_v43, 2  ;;  %v250_v60 = vor.u32 %v249_v48, %v248_v56  ;;  %vm253_vm9 = vcmp.lt.s32.totalorder %v1467_v43, 3 }
  0xb8   : > { %vm254_vm10 = vcmp.lt.s32.totalorder %v1467_v43, 4  ;;  %v259_v61 = vsel %vm251_vm6, %v238_v35, %v241_v36  ;;  %v484_v42 = vsel %vm482_vm7, %v483_v58, %v1501_v34  ;;  %v263_v49 = vsel %vm251_vm6, %v241_v36, %v244_v54 }
  0xb9   : > { %v256_v62 = vsel %vm254_vm10, %v244_v54, 2102212464  ;;  %v260_v63 = vsel %vm254_vm10, %v247_v59, 920167782  ;;  %v485_v1 = vadd.s32 %v484_v42, %v480_v52  ;;  %v255_v2 = vsel %vm251_vm6, %v235_v40, %v238_v35 }
  0xba   : > { %v261_v3 = vsel %vm253_vm9, %v244_v54, %v260_v63  ;;  %v264_v4 = vsel %vm254_vm10, %v250_v60, 1326507024  ;;  %v257_v5 = vsel %vm253_vm9, %v241_v36, %v256_v62  ;;  %v538_v8 = vadd.s32 1, %v1473_v50 }
  0xbb   : > { %v262_v6 = vsel %vm252_vm8, %v259_v61, %v261_v3  ;;  %v265_v7 = vsel %vm253_vm9, %v247_v59, %v264_v4  ;;  %v486_v11 = vadd.s32 536870912, %v485_v1  ;;  %v535_v21 = vand.u32 8388607, %v528_v45 }
  0xbc   : > { %v266_v12 = vsel %vm252_vm8, %v263_v49, %v265_v7  ;;  %v1524_v13 = vmul.u32.u64.low %v1469_v44, %v262_v6  ;;  %v1525_v14 = vmul.u32.u64.high %v1469_v44, %v262_v6, %v1524_v13  ;;  %vm539_vm11 = vcmp.gt.s32.totalorder %v538_v8, 0 }
  0xbd   : > { %v1529_v17 = vmul.u32.u64.low %v1469_v44, %v266_v12  ;;  %v1530_v19 = vmul.u32.u64.high %v1469_v44, %v266_v12, %v1529_v17  ;;  %v1534_v22 = vshrl.u32 %v486_v11, 30  ;;  %v258_v50 = vsel %vm252_vm8, %v255_v2, %v257_v5 }
  0xbe   : > { %v540_v23 = vsel %vm539_vm11, %v538_v8, 0  ;;  %v277_v26 = vadd.s32 1, %v1525_v14  ;;  %v1542_v27 = vadd.f32 %v1439_v10, %v1463_v41  ;;  %v274_v29 = vmul.u32 %v1469_v44, %v258_v50 }
  0xbf   : > { %v542_v24 = vand.u32 31, %v540_v23  ;;  %v488_v25 = vshll.u32 %v1534_v22, 30  ;;  %vm276_vm12 = vc.u32 %v1530_v19, %v1524_v13  ;;  %v536_v30 = vor.u32 8388608, %v535_v21 }
  0xc0   : > { %v278_v43 = vsel %vm276_vm12, %v277_v26, %v1525_v14  ;;  %v481_v36 = vadd.s32 %v1500_v33, %v1497_v32  ;;  %v322_v39 = vand.u32 2147483647, %v1542_v27  ;;  %v325_v44 = vand.u32 2139095040, %v1542_v27 }
  0xc1   : > { %v543_v31 = vsub.s32 32, %v542_v24  ;;  %v489_v34 = vsub.s32 %v485_v1, %v488_v25  ;;  %v279_v35 = vadd.s32 %v278_v43, %v274_v29  ;;  %v1551_v38 = vshll.u32 %v536_v30, 8 }
  0xc2   : > { %v541_v48 = vshrl.u32 %v540_v23, 5  ;;  %v511_v56 = vsub.s32 4, %v1534_v22  ;;  %v551_v32 = vshll.u32 %v1357_v53, %v542_v24  ;;  %v545_v60 = vshll.u32 %v1355_v47, %v542_v24 }
  0xc3   : > { %v491_v37 = vsub.s32 0, %v489_v34  ;;  %v280_v40 = vadd.s32 536870912, %v279_v35  ;;  %v552_v41 = vshrl.u32 %v1358_v55, %v543_v31  ;;  %v546_v52 = vshrl.u32 %v1356_v51, %v543_v31 }
  0xc4   : > { %v549_v54 = vshrl.u32 %v1357_v53, %v543_v31  ;;  %v555_v33 = vshrl.u32 %v1359_v57, %v543_v31  ;;  %v548_v61 = vshll.u32 %v1356_v51, %v542_v24  ;;  %v554_v42 = vshll.u32 %v1358_v55, %v542_v24 }
  0xc5   : > { %v1145_v46 = vmin.u32 %v491_v37, %v489_v34  ;;  %v1557_v58 = vshrl.u32 %v280_v40, 30  ;;  %v553_v63 = vor.u32 %v552_v41, %v551_v32  ;;  %v558_v49 = vshrl.u32 %v1360_v0, %v543_v31 }
  0xc6   : > { %v326_v1 = vshrl.u32 %v325_v44, 23  ;;  %v547_v3 = vor.u32 %v546_v52, %v545_v60  ;;  %v550_v4 = vor.u32 %v549_v54, %v548_v61  ;;  %v556_v5 = vor.u32 %v555_v33, %v554_v42 }
  0xc7   : > { %v493_v59 = vclz %v1145_v46  ;;  %v282_v62 = vshll.u32 %v1557_v58, 30  ;;  %v544_v7 = vshrl.u32 %v1355_v47, %v543_v31  ;;  %v557_v8 = vshll.u32 %v1359_v57, %v542_v24 }
  0xc8   : > { %vm560_vm13 = vcmp.lt.s32.totalorder %v541_v48, 1  ;;  %v305_v11 = vsub.s32 4, %v1557_v58  ;;  %vm561_vm0 = vcmp.lt.s32.totalorder %v541_v48, 2  ;;  %vm563_vm1 = vcmp.lt.s32.totalorder %v541_v48, 4 }
  0xc9   : > { %v1146_v2 = vadd.s32 4294967294, %v493_v59  ;;  %v1566_v6 = vsub.s32 %v279_v35, %v282_v62  ;;  %vm221_vm2 = vcmp.lt.s32.totalorder %v1447_v16, 0  ;;  %v559_v17 = vor.u32 %v558_v49, %v557_v8 }
  0xca   : > { %v565_v21 = vsel %vm563_vm1, %v553_v63, 2102212464  ;;  %v568_v24 = vsel %vm560_vm13, %v547_v3, %v550_v4  ;;  %v569_v25 = vsel %vm563_vm1, %v556_v5, 920167782  ;;  %vm562_vm3 = vcmp.lt.s32.totalorder %v541_v48, 3 }
  0xcb   : > { %vm1147_vm15 = vcmp.lt.s32.totalorder %v1146_v2, 0  ;;  %v285_v14 = vsub.s32 0, %v1566_v6  ;;  %v564_v30 = vsel %vm560_vm13, %v544_v7, %v547_v3  ;;  %v570_v35 = vsel %vm562_vm3, %v553_v63, %v569_v25 }
  0xcc   : > { %v496_v12 = vsel %vm1147_vm15, 0, %v1146_v2  ;;  %v572_v37 = vsel %vm560_vm13, %v550_v4, %v553_v63  ;;  %v566_v41 = vsel %vm562_vm3, %v550_v4, %v565_v21  ;;  %v571_v44 = vsel %vm561_vm0, %v568_v24, %v570_v35 }
  0xcd   : > { %v497_v50 = vsub.s32 32, %v496_v12  ;;  %v501_v23 = vsub.s32 4294967266, %v496_v12  ;;  %v498_v26 = vshll.u32 %v489_v34, %v496_v12  ;;  %v1137_v29 = vmin.u32 %v285_v14, %v1566_v6 }
  0xce   : > { %v573_v46 = vsel %vm563_vm1, %v559_v17, 1326507024  ;;  %vm1584_vm4 = vcmp.le.f32.partialorder %v425_v18, 0.7853982  ;;  %vm1590_vm5 = vcmp.le.f32.partialorder %v219_v20, 0.7853982  ;;  %v567_v62 = vsel %vm561_vm0, %v564_v30, %v566_v41  ;;  %v183_v17 = vpop.permute.xlu1 %182 }
  0xcf   : > { %v499_v31 = vshrl.u32 %v481_v36, %v497_v50  ;;  %v502_v43 = vadd.s32 127, %v501_v23  ;;  %v287_v40 = vclz %v1137_v29  ;;  %v574_v32 = vsel %vm562_vm3, %v556_v5, %v573_v46  ;;  %v178_v29 = vpop.permute.xlu0 %177 }
  0xd0   : > { %v1140_v36 = vadd.s32 4294967169, %v326_v1  ;;  %v575_v60 = vsel %vm561_vm0, %v572_v37, %v574_v32  ;;  %v1596_v61 = vmul.u32.u64.low %v1551_v38, %v571_v44  ;;  %v1597_v42 = vmul.u32.u64.high %v1551_v38, %v571_v44, %v1596_v61 }
  0xd1   : > { %v500_v52 = vor.u32 %v499_v31, %v498_v26  ;;  %v503_v54 = vshll.u32 %v502_v43, 23  ;;  %v1138_v59 = vadd.s32 4294967294, %v287_v40  ;;  %v512_v20 = vsel %vm427_vm14, %v511_v56, %v1534_v22 }
  0xd2   : > { %v1602_v63 = vmul.u32.u64.low %v1551_v38, %v575_v60  ;;  %v1603_v49 = vmul.u32.u64.high %v1551_v38, %v575_v60, %v1602_v63  ;;  %v275_v1 = vadd.s32 %v1524_v13, %v1530_v19  ;;  %v332_v2 = vadd.s32 1, %v1140_v36 }
  0xd3   : > { %v504_v18 = vor.u32 4788187, %v503_v54  ;;  %vm1139_vm6 = vcmp.lt.s32.totalorder %v1138_v59, 0  ;;  %v507_v4 = vcvt.s32.f32 %v500_v52  ;;  %v306_v48 = vsel %vm221_vm2, %v305_v11, %v1557_v58 }
  0xd4   : > { %v290_v5 = vsel %vm1139_vm6, 0, %v1138_v59  ;;  %v583_v12 = vmul.u32 %v1551_v38, %v567_v62  ;;  %v586_v14 = vadd.s32 1, %v1597_v42  ;;  %vm585_vm7 = vc.u32 %v1603_v49, %v1596_v61 }
  0xd5   : > { %v505_v3 = vand.u32 2147483647, %v504_v18  ;;  %v291_v7 = vsub.s32 32, %v290_v5  ;;  %v295_v8 = vsub.s32 4294967266, %v290_v5  ;;  %v292_v56 = vshll.u32 %v1566_v6, %v290_v5 }
  0xd6   : > { %vm333_vm8 = vcmp.gt.s32.totalorder %v332_v2, 0  ;;  %v587_v21 = vsel %vm585_vm7, %v586_v14, %v1597_v42  ;;  %v204_v38 = vmul.f32 %v1434_v9, %v183_v17  ;;  %v514_v24 = vsel %vm1584_vm4, 0, %v512_v20 }
  0xd7   : > { %v508_v22 = vmul.f32 %v507_v4, %v505_v3  ;;  %v293_v13 = vshrl.u32 %v275_v1, %v291_v7  ;;  %v296_v19 = vadd.s32 127, %v295_v8  ;;  %v334_v50 = vsel %vm333_vm8, %v332_v2, 0 }
  0xd8   : > { %v588_v11 = vadd.s32 %v587_v21, %v583_v12  ;;  %v336_v23 = vand.u32 31, %v334_v50  ;;  %v329_v6 = vand.u32 8388607, %v322_v39  ;;  %v308_v31 = vsel %vm1590_vm5, 0, %v306_v48 }
  0xd9   : > { %v509_v58 = vxor.u32 2147483648, %v508_v22  ;;  %v294_v25 = vor.u32 %v293_v13, %v292_v56  ;;  %v297_v26 = vshll.u32 %v296_v19, 23  ;;  %v1631_v41 = vand.u32 3, %v514_v24 }
  0xda   : > { %v589_v43 = vadd.s32 536870912, %v588_v11  ;;  %v337_v35 = vsub.s32 32, %v336_v23  ;;  %v1636_v46 = vmul.f32 %v1434_v9, %v178_v29  ;;  %v1638_v32 = vand.u32 3, %v308_v31 }
  0xdb   : > { %v510_v30 = vsel %vm427_vm14, %v509_v58, %v508_v22  ;;  %v298_v40 = vor.u32 4788187, %v297_v26  ;;  %v301_v54 = vcvt.s32.f32 %v294_v25  ;;  %v330_v59 = vor.u32 8388608, %v329_v6 }
  0xdc   : > { %v513_v37 = vsel %vm1584_vm4, %v1444_v15, %v510_v30  ;;  %v1633_v44 = vshrl.u32 %v589_v43, 30  ;;  %v340_v34 = vshrl.u32 %v1356_v51, %v337_v35  ;;  %v1643_v60 = vadd.f32 %v1439_v10, %v204_v38 }
  0xdd   : > { %1256 = vcosq.f32 %v513_v37  ;;  %v299_v52 = vand.u32 2147483647, %v298_v40  ;;  %v343_v18 = vshrl.u32 %v1357_v53, %v337_v35  ;;  %v346_v62 = vshrl.u32 %v1358_v55, %v337_v35 }
  0xde   : > { %1258 = vsinq.f32 %v513_v37  ;;  %v591_v36 = vshll.u32 %v1633_v44, 30  ;;  %v349_v63 = vshrl.u32 %v1359_v57, %v337_v35  ;;  %vm523_vm9 = vcmp.eq.s32.totalorder %v1631_v41, 2 }
  0xdf   : > { %v302_v42 = vmul.f32 %v301_v54, %v299_v52  ;;  %v1651_v1 = vshrl.u32 %v334_v50, 5  ;;  %v339_v2 = vshll.u32 %v1355_v47, %v336_v23  ;;  %v342_v3 = vshll.u32 %v1356_v51, %v336_v23 }
  0xe0   : > { %v1649_v20 = vsub.s32 %v588_v11, %v591_v36  ;;  %vm520_vm10 = vcmp.eq.s32.totalorder %v1631_v41, 0  ;;  %v345_v5 = vshll.u32 %v1357_v53, %v336_v23  ;;  %v348_v48 = vshll.u32 %v1358_v55, %v336_v23 }
  0xe1   : > { %v303_v4 = vxor.u32 2147483648, %v302_v42  ;;  %v352_v7 = vshrl.u32 %v1360_v0, %v337_v35  ;;  %vm519_vm11 = vcmp.lt.s32.totalorder %v1631_v41, 2  ;;  %v584_v8 = vadd.s32 %v1596_v61, %v1603_v49 }
  0xe2   : > { %v594_v12 = vsub.s32 0, %v1649_v20  ;;  %v341_v14 = vor.u32 %v340_v34, %v339_v2  ;;  %v351_v17 = vshll.u32 %v1359_v57, %v336_v23  ;;  %vm517_vm12 = vweird.f32 %v1444_v15 }
  0xe3   : > { %v304_v22 = vsel %vm221_vm2, %v303_v4, %v302_v42  ;;  %v344_v56 = vor.u32 %v343_v18, %v342_v3  ;;  %v347_v13 = vor.u32 %v346_v62, %v345_v5  ;;  %v350_v19 = vor.u32 %v349_v63, %v348_v48 }
  0xe4   : > { %v307_v21 = vsel %vm1590_vm5, %v1447_v16, %v304_v22  ;;  %v1149_v61 = vmin.u32 %v594_v12, %v1649_v20  ;;  %v353_v49 = vor.u32 %v352_v7, %v351_v17  ;;  %v1672_v50 = vshll.u32 %v330_v59, 8 }
  0xe5   : > { %1260 = vcosq.f32 %v307_v21  ;;  %v338_v58 = vshrl.u32 %v1355_v47, %v337_v35  ;;  %vm354_vm13 = vcmp.lt.s32.totalorder %v1651_v1, 1  ;;  %vm355_vm14 = vcmp.lt.s32.totalorder %v1651_v1, 2 }
  0xe6   : > { %1262 = vsinq.f32 %v307_v21  ;;  %v596_v23 = vclz %v1149_v61  ;;  %vm356_vm15 = vcmp.lt.s32.totalorder %v1651_v1, 3  ;;  %vm357_vm0 = vcmp.lt.s32.totalorder %v1651_v1, 4 }
  0xe7   : > { %v1257_v11 = vpop.eup %1256  ;;  %v362_v24 = vsel %vm354_vm13, %v341_v14, %v344_v56  ;;  %v363_v25 = vsel %vm357_vm0, %v350_v19, 920167782  ;;  %v366_v26 = vsel %vm354_vm13, %v344_v56, %v347_v13  ;;  %v367_v31 = vsel %vm357_vm0, %v353_v49, 1326507024 }
  0xe8   : > { %v1259_v33 = vpop.eup %1258  ;;  %v524_v38 = vxor.u32 2147483648, %v1257_v11  ;;  %v1150_v29 = vadd.s32 4294967294, %v596_v23  ;;  %v364_v30 = vsel %vm356_vm15, %v347_v13, %v363_v25  ;;  %vm530_vm1 = vcmp.lt.s32.totalorder %v1459_v28, 0 }
  0xe9   : > { %v521_v6 = vxor.u32 2147483648, %v1259_v33  ;;  %v358_v35 = vsel %vm354_vm13, %v338_v58, %v341_v14  ;;  %v359_v37 = vsel %vm357_vm0, %v347_v13, 2102212464  ;;  %v368_v40 = vsel %vm356_vm15, %v350_v19, %v367_v31 }
  0xea   : > { %v525_v43 = vsel %vm523_vm9, %v524_v38, %v1259_v33  ;;  %vm1151_vm2 = vcmp.lt.s32.totalorder %v1150_v29, 0  ;;  %v365_v54 = vsel %vm355_vm14, %v362_v24, %v364_v30  ;;  %v369_v36 = vsel %vm355_vm14, %v366_v26, %v368_v40 }
  0xeb   : > { %v522_v52 = vsel %vm520_vm10, %v1257_v11, %v521_v6  ;;  %v599_v34 = vsel %vm1151_vm2, 0, %v1150_v29  ;;  %v1703_v42 = vmul.u32.u64.low %v1672_v50, %v369_v36  ;;  %v1704_v18 = vmul.u32.u64.high %v1672_v50, %v369_v36, %v1703_v42 }
  0xec   : > { %v526_v59 = vsel %vm519_vm11, %v522_v52, %v525_v43  ;;  %vm311_vm3 = vweird.f32 %v1447_v16  ;;  %vm1711_vm4 = vcmp.le.f32.partialorder %v528_v45, 0.7853982  ;;  %v600_v2 = vsub.s32 32, %v599_v34 }
  0xed   : > { %v527_v62 = vsel %vm517_vm12, nan, %v526_v59  ;;  %v604_v3 = vsub.s32 4294967266, %v599_v34  ;;  %v360_v41 = vsel %vm356_vm15, %v344_v56, %v359_v37  ;;  %vm314_vm5 = vcmp.eq.s32.totalorder %v1638_v32, 0  ;;  %v193_v37 = vpop.permute.xlu1 %192 }
  0xee   : > { %1045 = vst [vmem:[%s1717_s4 + $0x10] sm:$0xff] %v527_v62  ;;  %v1722_v15 = vmul.u32.u64.low %v1672_v50, %v365_v54  ;;  %v1723_v4 = vmul.u32.u64.high %v1672_v50, %v365_v54, %v1722_v15  ;;  %v737_v45 = vand.u32 2139095040, %v1643_v60  ;;  %v601_v5 = vshll.u32 %v1649_v20, %v599_v34 }
  0xef   : > { %v602_v48 = vshrl.u32 %v584_v8, %v600_v2  ;;  %v605_v7 = vadd.s32 127, %v604_v3  ;;  %v614_v12 = vsub.s32 4, %v1633_v44  ;;  %v1261_v14 = vpop.eup %1260  ;;  %vm317_vm6 = vcmp.eq.s32.totalorder %v1638_v32, 2 }
  0xf0   : > { %v361_v17 = vsel %vm355_vm14, %v358_v35, %v360_v41  ;;  %v738_v22 = vshrl.u32 %v737_v45, 23  ;;  %v1733_v56 = vadd.f32 %v1439_v10, %v1636_v46  ;;  %v1263_v13 = vpop.eup %1262  ;;  %v318_v19 = vxor.u32 2147483648, %v1261_v14 }
  0xf1   : > { %v603_v21 = vor.u32 %v602_v48, %v601_v5  ;;  %v606_v61 = vshll.u32 %v605_v7, 23  ;;  %vm379_vm7 = vc.u32 %v1704_v18, %v1722_v15  ;;  %v315_v20 = vxor.u32 2147483648, %v1263_v13 }
  0xf2   : > { %v380_v8 = vadd.s32 1, %v1723_v4  ;;  %v734_v49 = vand.u32 2147483647, %v1643_v60  ;;  %v1156_v58 = vadd.s32 4294967169, %v738_v22  ;;  %v319_v11 = vsel %vm317_vm6, %v318_v19, %v1263_v13 }
  0xf3   : > { %v607_v1 = vor.u32 4788187, %v606_v61  ;;  %v615_v46 = vsel %vm530_vm1, %v614_v12, %v1633_v44  ;;  %v377_v23 = vmul.u32 %v1672_v50, %v361_v17  ;;  %vm313_vm8 = vcmp.lt.s32.totalorder %v1638_v32, 2 }
  0xf4   : > { %v316_v33 = vsel %vm314_vm5, %v1261_v14, %v315_v20  ;;  %v381_v38 = vsel %vm379_vm7, %v380_v8, %v1723_v4  ;;  %v744_v24 = vadd.s32 1, %v1156_v58  ;;  %v610_v6 = vcvt.s32.f32 %v603_v21 }
  0xf5   : > { %v320_v25 = vsel %vm313_vm8, %v316_v33, %v319_v11  ;;  %v608_v26 = vand.u32 2147483647, %v607_v1  ;;  %v382_v29 = vadd.s32 %v381_v38, %v377_v23  ;;  %v617_v44 = vsel %vm1711_vm4, 0, %v615_v46 }
  0xf6   : > { %v321_v30 = vsel %vm311_vm3, nan, %v320_v25  ;;  %v741_v50 = vand.u32 8388607, %v734_v49  ;;  %vm745_vm9 = vcmp.gt.s32.totalorder %v744_v24, 0  ;;  %v634_v35 = vand.u32 2139095040, %v1733_v56 }
  0xf7   : > { %1043 = vst [vmem:[%s1717_s4] sm:$0xff] %v321_v30  ;;  %v611_v32 = vmul.f32 %v610_v6, %v608_v26  ;;  %v383_v31 = vadd.s32 536870912, %v382_v29  ;;  %v746_v43 = vsel %vm745_vm9, %v744_v24, 0  ;;  %v1756_v16 = vand.u32 3, %v617_v44 }
  0xf8   : > { %v748_v40 = vand.u32 31, %v746_v43  ;;  %v1759_v59 = vmul.f32 %v1434_v9, %v193_v37  ;;  %v742_v62 = vor.u32 8388608, %v741_v50  ;;  %v635_v2 = vshrl.u32 %v634_v35, 23 }
  0xf9   : > { %v612_v52 = vxor.u32 2147483648, %v611_v32  ;;  %v1754_v54 = vshrl.u32 %v383_v31, 30  ;;  %v378_v7 = vadd.s32 %v1722_v15, %v1704_v18  ;;  %v747_v12 = vshrl.u32 %v746_v43, 5 }
  0xfa   : > { %v749_v36 = vsub.s32 32, %v748_v40  ;;  %v751_v41 = vshll.u32 %v1355_v47, %v748_v40  ;;  %v754_v5 = vshll.u32 %v1356_v51, %v748_v40  ;;  %v757_v63 = vshll.u32 %v1357_v53, %v748_v40 }
  0xfb   : > { %v613_v34 = vsel %vm530_vm1, %v612_v52, %v611_v32  ;;  %v385_v42 = vshll.u32 %v1754_v54, 30  ;;  %v760_v21 = vshll.u32 %v1358_v55, %v748_v40  ;;  %v763_v61 = vshll.u32 %v1359_v57, %v748_v40 }
  0xfc   : > { %v616_v3 = vsel %vm1711_vm4, %v1459_v28, %v613_v34  ;;  %v752_v4 = vshrl.u32 %v1356_v51, %v749_v36  ;;  %v755_v45 = vshrl.u32 %v1357_v53, %v749_v36  ;;  %v758_v48 = vshrl.u32 %v1358_v55, %v749_v36 }
  0xfd   : > { %1264 = vcosq.f32 %v616_v3  ;;  %v1770_v9 = vsub.s32 %v382_v29, %v385_v42  ;;  %v761_v13 = vshrl.u32 %v1359_v57, %v749_v36  ;;  %v764_v20 = vshrl.u32 %v1360_v0, %v749_v36 }
  0xfe   : > { %1266 = vsinq.f32 %v616_v3  ;;  %v753_v17 = vor.u32 %v752_v4, %v751_v41  ;;  %v756_v22 = vor.u32 %v755_v45, %v754_v5  ;;  %v759_v19 = vor.u32 %v758_v48, %v757_v63 }
  0xff   : > { %v388_v14 = vsub.s32 0, %v1770_v9  ;;  %vm626_vm10 = vcmp.eq.s32.totalorder %v1756_v16, 2  ;;  %vm324_vm11 = vcmp.lt.s32.totalorder %v1542_v27, 0  ;;  %v408_v15 = vsub.s32 4, %v1754_v54 }
 0x100   : > { %v782_v8 = vshll.u32 %v742_v62, 8  ;;  %v1152_v58 = vadd.s32 4294967169, %v635_v2  ;;  %vm623_vm12 = vcmp.eq.s32.totalorder %v1756_v16, 0  ;;  %v750_v11 = vshrl.u32 %v1355_v47, %v749_v36 }
 0x101   : > { %v1141_v18 = vmin.u32 %v388_v14, %v1770_v9  ;;  %v762_v1 = vor.u32 %v761_v13, %v760_v21  ;;  %v765_v46 = vor.u32 %v764_v20, %v763_v61  ;;  %vm766_vm13 = vcmp.lt.s32.totalorder %v747_v12, 1 }
 0x102   : > { %vm622_vm14 = vcmp.lt.s32.totalorder %v1756_v16, 2  ;;  %vm768_vm15 = vcmp.lt.s32.totalorder %v747_v12, 3  ;;  %vm769_vm0 = vcmp.lt.s32.totalorder %v747_v12, 4  ;;  %v774_v33 = vsel %vm766_vm13, %v753_v17, %v756_v22 }
 0x103   : > { %v390_v23 = vclz %v1141_v18  ;;  %vm620_vm1 = vweird.f32 %v1459_v28  ;;  %v771_v38 = vsel %vm769_vm0, %v759_v19, 2102212464  ;;  %v775_v24 = vsel %vm769_vm0, %v762_v1, 920167782 }
 0x104   : > { %v778_v25 = vsel %vm766_vm13, %v756_v22, %v759_v19  ;;  %v779_v26 = vsel %vm769_vm0, %v765_v46, 1326507024  ;;  %vm767_vm2 = vcmp.lt.s32.totalorder %v747_v12, 2  ;;  %v776_v29 = vsel %vm768_vm15, %v759_v19, %v775_v24 }
 0x105   : > { %v1142_v6 = vadd.s32 4294967294, %v390_v23  ;;  %v780_v30 = vsel %vm768_vm15, %v762_v1, %v779_v26  ;;  %v770_v44 = vsel %vm766_vm13, %v750_v11, %v753_v17  ;;  %v777_v50 = vsel %vm767_vm2, %v774_v33, %v776_v29 }
 0x106   : > { %v781_v32 = vsel %vm767_vm2, %v778_v25, %v780_v30  ;;  %v641_v31 = vadd.s32 1, %v1152_v58  ;;  %v772_v35 = vsel %vm768_vm15, %v756_v22, %v771_v38  ;;  %v631_v4 = vand.u32 2147483647, %v1733_v56 }
 0x107   : > { %v1265_v43 = vpop.eup %1264  ;;  %vm1143_vm3 = vcmp.lt.s32.totalorder %v1142_v6, 0  ;;  %v1794_v37 = vmul.u32.u64.low %v782_v8, %v781_v32  ;;  %v1795_v40 = vmul.u32.u64.high %v782_v8, %v781_v32, %v1794_v37  ;;  %v409_v5 = vsel %vm324_vm11, %v408_v15, %v1754_v54 }
 0x108   : > { %v1267_v52 = vpop.eup %1266  ;;  %v627_v36 = vxor.u32 2147483648, %v1265_v43  ;;  %v393_v34 = vsel %vm1143_vm3, 0, %v1142_v6  ;;  %v1797_v42 = vmul.u32.u64.low %v782_v8, %v777_v50  ;;  %v1798_v62 = vmul.u32.u64.high %v782_v8, %v777_v50, %v1797_v42 }
 0x109   : > { %v624_v2 = vxor.u32 2147483648, %v1267_v52  ;;  %v394_v3 = vsub.s32 32, %v393_v34  ;;  %v398_v41 = vsub.s32 4294967266, %v393_v34  ;;  %v773_v48 = vsel %vm767_vm2, %v770_v44, %v772_v35 }
 0x10a   : > { %v628_v45 = vsel %vm626_vm10, %v627_v36, %v1267_v52  ;;  %vm642_vm4 = vcmp.gt.s32.totalorder %v641_v31, 0  ;;  %v395_v14 = vshll.u32 %v1770_v9, %v393_v34  ;;  %vm791_vm5 = vc.u32 %v1795_v40, %v1797_v42 }
 0x10b   : > { %v625_v63 = vsel %vm623_vm12, %v1265_v43, %v624_v2  ;;  %v396_v17 = vshrl.u32 %v378_v7, %v394_v3  ;;  %v399_v22 = vadd.s32 127, %v398_v41  ;;  %v792_v19 = vadd.s32 1, %v1798_v62 }
 0x10c   : > { %v629_v13 = vsel %vm622_vm14, %v625_v63, %v628_v45  ;;  %v643_v21 = vsel %vm642_vm4, %v641_v31, 0  ;;  %v789_v20 = vmul.u32 %v782_v8, %v773_v48  ;;  %vm1822_vm6 = vcmp.le.f32.partialorder %v322_v39, 0.7853982 }
 0x10d   : > { %v630_v54 = vsel %vm620_vm1, nan, %v629_v13  ;;  %v397_v12 = vor.u32 %v396_v17, %v395_v14  ;;  %v400_v61 = vshll.u32 %v399_v22, 23  ;;  %v793_v9 = vsel %vm791_vm5, %v792_v19, %v1798_v62 }
 0x10e   : > { %1046 = vst [vmem:[%s1717_s4 + $0x18] sm:$0xff] %v630_v54  ;;  %v645_v7 = vand.u32 31, %v643_v21  ;;  %v794_v15 = vadd.s32 %v793_v9, %v789_v20  ;;  %v638_v58 = vand.u32 8388607, %v631_v4  ;;  %v411_v11 = vsel %vm1822_vm6, 0, %v409_v5 }
 0x10f   : > { %v401_v18 = vor.u32 4788187, %v400_v61  ;;  %v404_v28 = vcvt.s32.f32 %v397_v12  ;;  %v1832_v1 = vadd.f32 %v1439_v10, %v1759_v59  ;;  %v644_v30 = vshrl.u32 %v643_v21, 5 }
 0x110   : > { %v646_v8 = vsub.s32 32, %v645_v7  ;;  %v795_v23 = vadd.s32 536870912, %v794_v15  ;;  %v648_v39 = vshll.u32 %v1355_v47, %v645_v7  ;;  %v651_v33 = vshll.u32 %v1356_v51, %v645_v7 }
 0x111   : > { %v402_v46 = vand.u32 2147483647, %v401_v18  ;;  %v654_v25 = vshll.u32 %v1357_v53, %v645_v7  ;;  %v657_v50 = vshll.u32 %v1358_v55, %v645_v7  ;;  %v660_v32 = vshll.u32 %v1359_v57, %v645_v7 }
 0x112   : > { %v649_v38 = vshrl.u32 %v1356_v51, %v646_v8  ;;  %v652_v24 = vshrl.u32 %v1357_v53, %v646_v8  ;;  %v655_v26 = vshrl.u32 %v1358_v55, %v646_v8  ;;  %v1840_v29 = vshrl.u32 %v795_v23, 30 }
 0x113   : > { %v405_v6 = vmul.f32 %v404_v28, %v402_v46  ;;  %v658_v10 = vshrl.u32 %v1359_v57, %v646_v8  ;;  %v661_v59 = vshrl.u32 %v1360_v0, %v646_v8  ;;  %v639_v52 = vor.u32 8388608, %v638_v58 }
 0x114   : > { %v650_v44 = vor.u32 %v649_v38, %v648_v39  ;;  %v797_v43 = vshll.u32 %v1840_v29, 30  ;;  %v653_v35 = vor.u32 %v652_v24, %v651_v33  ;;  %v656_v37 = vor.u32 %v655_v26, %v654_v25 }
 0x115   : > { %v406_v31 = vxor.u32 2147483648, %v405_v6  ;;  %v659_v36 = vor.u32 %v658_v10, %v657_v50  ;;  %v662_v34 = vor.u32 %v661_v59, %v660_v32  ;;  %v1849_v2 = vand.u32 3, %v411_v11 }
 0x116   : > { %v1851_v3 = vsub.s32 %v794_v15, %v797_v43  ;;  %v943_v41 = vand.u32 2139095040, %v1832_v1  ;;  %v647_v5 = vshrl.u32 %v1355_v47, %v646_v8  ;;  %vm663_vm7 = vcmp.lt.s32.totalorder %v644_v30, 1 }
 0x117   : > { %v407_v62 = vsel %vm324_vm11, %v406_v31, %v405_v6  ;;  %vm666_vm8 = vcmp.lt.s32.totalorder %v644_v30, 4  ;;  %v671_v14 = vsel %vm663_vm7, %v650_v44, %v653_v35  ;;  %v675_v22 = vsel %vm663_vm7, %v653_v35, %v656_v37 }
 0x118   : > { %v410_v45 = vsel %vm1822_vm6, %v1542_v27, %v407_v62  ;;  %v800_v48 = vsub.s32 0, %v1851_v3  ;;  %v668_v63 = vsel %vm666_vm8, %v656_v37, 2102212464  ;;  %v672_v17 = vsel %vm666_vm8, %v659_v36, 920167782 }
 0x119   : > { %1268 = vcosq.f32 %v410_v45  ;;  %v676_v13 = vsel %vm666_vm8, %v662_v34, 1326507024  ;;  %vm664_vm9 = vcmp.lt.s32.totalorder %v644_v30, 2  ;;  %vm665_vm10 = vcmp.lt.s32.totalorder %v644_v30, 3 }
 0x11a   : > { %1270 = vsinq.f32 %v410_v45  ;;  %v1157_v19 = vmin.u32 %v800_v48, %v1851_v3  ;;  %v679_v21 = vshll.u32 %v639_v52, 8  ;;  %v667_v54 = vsel %vm663_vm7, %v647_v5, %v650_v44  ;;  %v188_v5 = vpop.permute.xlu0 %187 }
 0x11b   : > { %v673_v12 = vsel %vm665_vm10, %v656_v37, %v672_v17  ;;  %v677_v61 = vsel %vm665_vm10, %v659_v36, %v676_v13  ;;  %v944_v20 = vshrl.u32 %v943_v41, 23  ;;  %v669_v7 = vsel %vm665_vm10, %v653_v35, %v668_v63 }
 0x11c   : > { %v802_v9 = vclz %v1157_v19  ;;  %v674_v16 = vsel %vm664_vm9, %v671_v14, %v673_v12  ;;  %v678_v18 = vsel %vm664_vm9, %v675_v22, %v677_v61  ;;  %vm416_vm11 = vcmp.lt.s32.totalorder %v1849_v2, 2 }
 0x11d   : > { %v1862_v15 = vmul.u32.u64.low %v679_v21, %v678_v18  ;;  %v1863_v58 = vmul.u32.u64.high %v679_v21, %v678_v18, %v1862_v15  ;;  %v1865_v28 = vmul.u32.u64.low %v679_v21, %v674_v16  ;;  %v1866_v11 = vmul.u32.u64.high %v679_v21, %v674_v16, %v1865_v28 }
 0x11e   : > { %v1158_v8 = vadd.s32 4294967294, %v802_v9  ;;  %v1164_v46 = vadd.s32 4294967169, %v944_v20  ;;  %vm420_vm12 = vcmp.eq.s32.totalorder %v1849_v2, 2  ;;  %vm736_vm13 = vcmp.lt.s32.totalorder %v1643_v60, 0 }
 0x11f   : > { %v670_v23 = vsel %vm664_vm9, %v667_v54, %v669_v7  ;;  %v790_v39 = vadd.s32 %v1797_v42, %v1795_v40  ;;  %v940_v33 = vand.u32 2147483647, %v1832_v1  ;;  %v820_v25 = vsub.s32 4, %v1840_v29 }
 0x120   : > { %vm1159_vm14 = vcmp.lt.s32.totalorder %v1158_v8, 0  ;;  %v950_v38 = vadd.s32 1, %v1164_v46  ;;  %vm688_vm15 = vc.u32 %v1863_v58, %v1865_v28  ;;  %v689_v26 = vadd.s32 1, %v1866_v11 }
 0x121   : > { %v805_v24 = vsel %vm1159_vm14, 0, %v1158_v8  ;;  %v686_v30 = vmul.u32 %v679_v21, %v670_v23  ;;  %vm417_vm1 = vcmp.eq.s32.totalorder %v1849_v2, 0  ;;  %v821_v36 = vsel %vm736_vm13, %v820_v25, %v1840_v29  ;;  %v1288_v21 = vld [vmem:[%s2084_s1] ss:$0 sm:$0xff] }
 0x122   : > { %v806_v10 = vsub.s32 32, %v805_v24  ;;  %v810_v59 = vsub.s32 4294967266, %v805_v24  ;;  %vm951_vm0 = vcmp.gt.s32.totalorder %v950_v38, 0  ;;  %v807_v40 = vshll.u32 %v1851_v3, %v805_v24 }
 0x123   : > { %v1269_v6 = vpop.eup %1268  ;;  %v690_v42 = vsel %vm688_vm15, %v689_v26, %v1866_v11  ;;  %v952_v32 = vsel %vm951_vm0, %v950_v38, 0  ;;  %vm414_vm2 = vweird.f32 %v1542_v27  ;;  %v947_v63 = vand.u32 8388607, %v940_v33 }
 0x124   : > { %v1271_v44 = vpop.eup %1270  ;;  %v421_v50 = vxor.u32 2147483648, %v1269_v6  ;;  %v808_v43 = vshrl.u32 %v790_v39, %v806_v10  ;;  %v811_v35 = vadd.s32 127, %v810_v59  ;;  %v691_v37 = vadd.s32 %v690_v42, %v686_v30 }
 0x125   : > { %v418_v31 = vxor.u32 2147483648, %v1271_v44  ;;  %v954_v34 = vand.u32 31, %v952_v32  ;;  %vm1895_vm3 = vcmp.le.f32.partialorder %v734_v49, 0.7853982  ;;  %v205_v54 = vmul.f32 %v1288_v21, %v188_v5 }
 0x126   : > { %v422_v52 = vsel %vm420_vm12, %v421_v50, %v1271_v44  ;;  %v809_v3 = vor.u32 %v808_v43, %v807_v40  ;;  %v812_v41 = vshll.u32 %v811_v35, 23  ;;  %v692_v45 = vadd.s32 536870912, %v691_v37  ;;  %v1289_v50 = vld [vmem:[%s2084_s1 + $0x1] ss:$0 sm:$0xff] }
 0x127   : > { %v419_v62 = vsel %vm417_vm1, %v1269_v6, %v418_v31  ;;  %v955_v14 = vsub.s32 32, %v954_v34  ;;  %v823_v27 = vsel %vm1895_vm3, 0, %v821_v36  ;;  %v948_v9 = vor.u32 8388608, %v947_v63 }
 0x128   : > { %v423_v48 = vsel %vm416_vm11, %v419_v62, %v422_v52  ;;  %v813_v22 = vor.u32 4788187, %v812_v41  ;;  %v1899_v13 = vshrl.u32 %v692_v45, 30  ;;  %v816_v12 = vcvt.s32.f32 %v809_v3 }
 0x129   : > { %v424_v17 = vsel %vm414_vm2, nan, %v423_v48  ;;  %v958_v2 = vshrl.u32 %v1356_v51, %v955_v14  ;;  %v961_v19 = vshrl.u32 %v1357_v53, %v955_v14  ;;  %v964_v20 = vshrl.u32 %v1358_v55, %v955_v14 }
 0x12a   : > { %1044 = vst [vmem:[%s1717_s4 + $0x8] sm:$0xff] %v424_v17  ;;  %v814_v49 = vand.u32 2147483647, %v813_v22  ;;  %v694_v61 = vshll.u32 %v1899_v13, 30  ;;  %v957_v7 = vshll.u32 %v1355_v47, %v954_v34  ;;  %v960_v16 = vshll.u32 %v1356_v51, %v954_v34 }
 0x12b   : > { %v967_v18 = vshrl.u32 %v1359_v57, %v955_v14  ;;  %v953_v8 = vshrl.u32 %v952_v32, 5  ;;  %v963_v46 = vshll.u32 %v1357_v53, %v954_v34  ;;  %v966_v38 = vshll.u32 %v1358_v55, %v954_v34 }
 0x12c   : > { %v817_v15 = vmul.f32 %v816_v12, %v814_v49  ;;  %v1914_v11 = vsub.s32 %v691_v37, %v694_v61  ;;  %v959_v23 = vor.u32 %v958_v2, %v957_v7  ;;  %v962_v39 = vor.u32 %v961_v19, %v960_v16 }
 0x12d   : > { %v970_v24 = vshrl.u32 %v1360_v0, %v955_v14  ;;  %v965_v6 = vor.u32 %v964_v20, %v963_v46  ;;  %v969_v10 = vshll.u32 %v1359_v57, %v954_v34  ;;  %v1921_v59 = vand.u32 3, %v823_v27 }
 0x12e   : > { %v818_v25 = vxor.u32 2147483648, %v817_v15  ;;  %v697_v26 = vsub.s32 0, %v1914_v11  ;;  %v968_v30 = vor.u32 %v967_v18, %v966_v38  ;;  %v988_v44 = vshll.u32 %v948_v9, 8 }
 0x12f   : > { %v1926_v40 = vadd.f32 %v1289_v50, %v205_v54  ;;  %v956_v31 = vshrl.u32 %v1355_v47, %v955_v14  ;;  %v971_v43 = vor.u32 %v970_v24, %v969_v10  ;;  %vm972_vm4 = vcmp.lt.s32.totalorder %v953_v8, 1 }
 0x130   : > { %v819_v42 = vsel %vm736_vm13, %v818_v25, %v817_v15  ;;  %v1153_v32 = vmin.u32 %v697_v26, %v1914_v11  ;;  %vm973_vm5 = vcmp.lt.s32.totalorder %v953_v8, 2  ;;  %vm975_vm6 = vcmp.lt.s32.totalorder %v953_v8, 4 }
 0x131   : > { %v822_v35 = vsel %vm1895_vm3, %v1643_v60, %v819_v42  ;;  %v977_v52 = vsel %vm975_vm6, %v965_v6, 2102212464  ;;  %v980_v36 = vsel %vm972_vm4, %v959_v23, %v962_v39  ;;  %vm974_vm7 = vcmp.lt.s32.totalorder %v953_v8, 3 }
 0x132   : > { %1272 = vcosq.f32 %v822_v35  ;;  %v699_v37 = vclz %v1153_v32  ;;  %v981_v34 = vsel %vm975_vm6, %v968_v30, 920167782  ;;  %v984_v62 = vsel %vm972_vm4, %v962_v39, %v965_v6 }
 0x133   : > { %1274 = vsinq.f32 %v822_v35  ;;  %v976_v41 = vsel %vm972_vm4, %v956_v31, %v959_v23  ;;  %v982_v45 = vsel %vm974_vm7, %v965_v6, %v981_v34  ;;  %v985_v5 = vsel %vm975_vm6, %v971_v43, 1326507024 }
 0x134   : > { %v1154_v3 = vadd.s32 4294967294, %v699_v37  ;;  %v978_v48 = vsel %vm974_vm7, %v962_v39, %v977_v52  ;;  %v983_v63 = vsel %vm973_vm5, %v980_v36, %v982_v45  ;;  %v986_v14 = vsel %vm974_vm7, %v968_v30, %v985_v5 }
 0x135   : > { %v840_v17 = vand.u32 2139095040, %v1926_v40  ;;  %v987_v29 = vsel %vm973_vm5, %v984_v62, %v986_v14  ;;  %v1938_v22 = vmul.u32.u64.low %v988_v44, %v983_v63  ;;  %v1939_v27 = vmul.u32.u64.high %v988_v44, %v983_v63, %v1938_v22 }
 0x136   : > { %vm1155_vm8 = vcmp.lt.s32.totalorder %v1154_v3, 0  ;;  %v1942_v19 = vmul.u32.u64.low %v988_v44, %v987_v29  ;;  %v1943_v21 = vmul.u32.u64.high %v988_v44, %v987_v29, %v1942_v19  ;;  %v687_v49 = vadd.s32 %v1865_v28, %v1863_v58 }
 0x137   : > { %v702_v2 = vsel %vm1155_vm8, 0, %v1154_v3  ;;  %v841_v54 = vshrl.u32 %v840_v17, 23  ;;  %v979_v20 = vsel %vm973_vm5, %v976_v41, %v978_v48  ;;  %v998_v15 = vadd.s32 1, %v1939_v27 }
 0x138   : > { %v703_v12 = vsub.s32 32, %v702_v2  ;;  %v707_v61 = vsub.s32 4294967266, %v702_v2  ;;  %v704_v7 = vshll.u32 %v1914_v11, %v702_v2  ;;  %v995_v46 = vmul.u32 %v988_v44, %v979_v20 }
 0x139   : > { %v1160_v9 = vadd.s32 4294967169, %v841_v54  ;;  %vm997_vm9 = vc.u32 %v1943_v21, %v1938_v22  ;;  %v837_v23 = vand.u32 2147483647, %v1926_v40  ;;  %vm829_vm10 = vcmp.eq.s32.totalorder %v1921_v59, 0 }
 0x13a   : > { %v705_v16 = vshrl.u32 %v687_v49, %v703_v12  ;;  %v708_v18 = vadd.s32 127, %v707_v61  ;;  %v999_v8 = vsel %vm997_vm9, %v998_v15, %v1939_v27  ;;  %vm832_vm11 = vcmp.eq.s32.totalorder %v1921_v59, 2 }
 0x13b   : > { %v847_v39 = vadd.s32 1, %v1160_v9  ;;  %v1000_v25 = vadd.s32 %v999_v8, %v995_v46  ;;  %v717_v10 = vsub.s32 4, %v1899_v13  ;;  %v844_v42 = vand.u32 8388607, %v837_v23 }
 0x13c   : > { %v1273_v38 = vpop.eup %1272  ;;  %v706_v58 = vor.u32 %v705_v16, %v704_v7  ;;  %v709_v28 = vshll.u32 %v708_v18, 23  ;;  %vm828_vm13 = vcmp.lt.s32.totalorder %v1921_v59, 2  ;;  %vm826_vm14 = vweird.f32 %v1643_v60 }
 0x13d   : > { %v1275_v24 = vpop.eup %1274  ;;  %v833_v11 = vxor.u32 2147483648, %v1273_v38  ;;  %vm848_vm12 = vcmp.gt.s32.totalorder %v847_v39, 0  ;;  %v1001_v50 = vadd.s32 536870912, %v1000_v25  ;;  %vm1967_vm15 = vcmp.le.f32.partialorder %v631_v4, 0.7853982 }
 0x13e   : > { %v830_v26 = vxor.u32 2147483648, %v1275_v24  ;;  %v710_v6 = vor.u32 4788187, %v709_v28  ;;  %v849_v30 = vsel %vm848_vm12, %v847_v39, 0  ;;  %v713_v35 = vcvt.s32.f32 %v706_v58 }
 0x13f   : > { %v834_v44 = vsel %vm832_vm11, %v833_v11, %v1275_v24  ;;  %v851_v32 = vand.u32 31, %v849_v30  ;;  %v1963_v52 = vshrl.u32 %v1001_v50, 30  ;;  %vm633_vm0 = vcmp.lt.s32.totalorder %v1733_v56, 0 }
 0x140   : > { %v831_v31 = vsel %vm829_vm10, %v1273_v38, %v830_v26  ;;  %v711_v43 = vand.u32 2147483647, %v710_v6  ;;  %v718_v59 = vsel %vm633_vm0, %v717_v10, %v1899_v13  ;;  %v845_v60 = vor.u32 8388608, %v844_v42 }
 0x141   : > { %v835_v37 = vsel %vm828_vm13, %v831_v31, %v834_v44  ;;  %v852_v36 = vsub.s32 32, %v851_v32  ;;  %v1003_v41 = vshll.u32 %v1963_v52, 30  ;;  %v854_v48 = vshll.u32 %v1355_v47, %v851_v32 }
 0x142   : > { %v836_v34 = vsel %vm826_vm14, nan, %v835_v37  ;;  %v714_v3 = vmul.f32 %v713_v35, %v711_v43  ;;  %v857_v17 = vshll.u32 %v1356_v51, %v851_v32  ;;  %v860_v29 = vshll.u32 %v1357_v53, %v851_v32 }
 0x143   : > { %1048 = vst [vmem:[%s1717_s4 + $0x28] sm:$0xff] %v836_v34  ;;  %v855_v45 = vshrl.u32 %v1356_v51, %v852_v36  ;;  %v858_v63 = vshrl.u32 %v1357_v53, %v852_v36  ;;  %v861_v4 = vshrl.u32 %v1358_v55, %v852_v36  ;;  %v1979_v14 = vsub.s32 %v1000_v25, %v1003_v41 }
 0x144   : > { %v715_v5 = vxor.u32 2147483648, %v714_v3  ;;  %v864_v13 = vshrl.u32 %v1359_v57, %v852_v36  ;;  %v850_v2 = vshrl.u32 %v849_v30, 5  ;;  %v863_v54 = vshll.u32 %v1358_v55, %v851_v32 }
 0x145   : > { %v856_v19 = vor.u32 %v855_v45, %v854_v48  ;;  %v1006_v12 = vsub.s32 0, %v1979_v14  ;;  %v859_v61 = vor.u32 %v858_v63, %v857_v17  ;;  %v862_v20 = vor.u32 %v861_v4, %v860_v29 }
 0x146   : > { %v716_v27 = vsel %vm633_vm0, %v715_v5, %v714_v3  ;;  %v865_v9 = vor.u32 %v864_v13, %v863_v54  ;;  %v866_v51 = vshll.u32 %v1359_v57, %v851_v32  ;;  %v867_v53 = vshrl.u32 %v1360_v0, %v852_v36 }
 0x147   : > { %v719_v49 = vsel %vm1967_vm15, %v1733_v56, %v716_v27  ;;  %v720_v7 = vsel %vm1967_vm15, 0, %v718_v59  ;;  %v1165_v55 = vmin.u32 %v1006_v12, %v1979_v14  ;;  %v853_v16 = vshrl.u32 %v1355_v47, %v852_v36 }
 0x148   : > { %1276 = vcosq.f32 %v719_v49  ;;  %v868_v18 = vor.u32 %v867_v53, %v866_v51  ;;  %vm869_vm1 = vcmp.lt.s32.totalorder %v850_v2, 1  ;;  %v885_v15 = vshll.u32 %v845_v60, 8 }
 0x149   : > { %1278 = vsinq.f32 %v719_v49  ;;  %v1008_v46 = vclz %v1165_v55  ;;  %vm871_vm2 = vcmp.lt.s32.totalorder %v850_v2, 3  ;;  %vm872_vm3 = vcmp.lt.s32.totalorder %v850_v2, 4 }
 0x14a   : > { %v877_v39 = vsel %vm869_vm1, %v856_v19, %v859_v61  ;;  %v874_v38 = vsel %vm872_vm3, %v862_v20, 2102212464  ;;  %v878_v58 = vsel %vm872_vm3, %v865_v9, 920167782  ;;  %v881_v57 = vsel %vm869_vm1, %v859_v61, %v862_v20 }
 0x14b   : > { %v882_v28 = vsel %vm872_vm3, %v868_v18, 1326507024  ;;  %v1166_v0 = vadd.s32 4294967294, %v1008_v46  ;;  %vm870_vm4 = vcmp.lt.s32.totalorder %v850_v2, 2  ;;  %v879_v8 = vsel %vm871_vm2, %v862_v20, %v878_v58 }
 0x14c   : > { %v883_v24 = vsel %vm871_vm2, %v865_v9, %v882_v28  ;;  %v724_v11 = vand.u32 3, %v720_v7  ;;  %v873_v25 = vsel %vm869_vm1, %v853_v16, %v856_v19  ;;  %v880_v47 = vsel %vm870_vm4, %v877_v39, %v879_v8 }
 0x14d   : > { %v884_v26 = vsel %vm870_vm4, %v881_v57, %v883_v24  ;;  %vm1167_vm5 = vcmp.lt.s32.totalorder %v1166_v0, 0  ;;  %v875_v6 = vsel %vm871_vm2, %v859_v61, %v874_v38  ;;  %v996_v32 = vadd.s32 %v1938_v22, %v1943_v21 }
 0x14e   : > { %v2000_v10 = vmul.u32.u64.low %v885_v15, %v884_v26  ;;  %v2001_v30 = vmul.u32.u64.high %v885_v15, %v884_v26, %v2000_v10  ;;  %v1011_v44 = vsel %vm1167_vm5, 0, %v1166_v0  ;;  %vm726_vm6 = vcmp.eq.s32.totalorder %v724_v11, 0 }
 0x14f   : > { %v2003_v50 = vmul.u32.u64.low %v885_v15, %v880_v47  ;;  %v2004_v42 = vmul.u32.u64.high %v885_v15, %v880_v47, %v2003_v50  ;;  %v1012_v31 = vsub.s32 32, %v1011_v44  ;;  %v1016_v43 = vsub.s32 4294967266, %v1011_v44 }
 0x150   : > { %v876_v37 = vsel %vm870_vm4, %v873_v25, %v875_v6  ;;  %v1013_v62 = vshll.u32 %v1979_v14, %v1011_v44  ;;  %vm729_vm7 = vcmp.eq.s32.totalorder %v724_v11, 2  ;;  %vm725_vm9 = vcmp.lt.s32.totalorder %v724_v11, 2 }
 0x151   : > { %v1014_v3 = vshrl.u32 %v996_v32, %v1012_v31  ;;  %v1017_v59 = vadd.s32 127, %v1016_v43  ;;  %vm894_vm8 = vc.u32 %v2001_v30, %v2003_v50  ;;  %v895_v60 = vadd.s32 1, %v2004_v42 }
 0x152   : > { %v1277_v35 = vpop.eup %1276  ;;  %v892_v5 = vmul.u32 %v885_v15, %v876_v37  ;;  %vm723_vm10 = vweird.f32 %v1733_v56  ;;  %vm942_vm11 = vcmp.lt.s32.totalorder %v1832_v1, 0  ;;  %v1026_v61 = vsub.s32 4, %v1963_v52 }
 0x153   : > { %v1279_v36 = vpop.eup %1278  ;;  %v730_v34 = vxor.u32 2147483648, %v1277_v35  ;;  %v1015_v21 = vor.u32 %v1014_v3, %v1013_v62  ;;  %v1018_v45 = vshll.u32 %v1017_v59, 23  ;;  %v896_v63 = vsel %vm894_vm8, %v895_v60, %v2004_v42 }
 0x154   : > { %v727_v41 = vxor.u32 2147483648, %v1279_v36  ;;  %v897_v17 = vadd.s32 %v896_v63, %v892_v5  ;;  %vm941_vm12 = vcmp.le.f32.partialorder %v940_v33, 0.7853982  ;;  %v1027_v53 = vsel %vm942_vm11, %v1026_v61, %v1963_v52 }
 0x155   : > { %v731_v22 = vsel %vm729_vm7, %v730_v34, %v1279_v36  ;;  %v1019_v14 = vor.u32 4788187, %v1018_v45  ;;  %v1022_v27 = vcvt.s32.f32 %v1015_v21  ;;  %v1029_v55 = vsel %vm941_vm12, 0, %v1027_v53 }
 0x156   : > { %v728_v48 = vsel %vm726_vm6, %v1277_v35, %v727_v41  ;;  %v898_v2 = vadd.s32 536870912, %v897_v17  ;;  %v1033_v15 = vand.u32 3, %v1029_v55  ;;  %v893_v38 = vadd.s32 %v2003_v50, %v2001_v30 }
 0x157   : > { %v732_v4 = vsel %vm725_vm9, %v728_v48, %v731_v22  ;;  %v1020_v13 = vand.u32 2147483647, %v1019_v14  ;;  %vm1032_vm1 = vweird.f32 %v1832_v1  ;;  %vm839_vm2 = vcmp.lt.s32.totalorder %v1926_v40, 0 }
 0x158   : > { %v733_v29 = vsel %vm723_vm10, nan, %v732_v4  ;;  %v899_v54 = vshrl.u32 %v898_v2, 30  ;;  %vm1038_vm14 = vcmp.eq.s32.totalorder %v1033_v15, 2  ;;  %vm1035_vm15 = vcmp.eq.s32.totalorder %v1033_v15, 0 }
 0x159   : > { %1047 = vst [vmem:[%s1717_s4 + $0x20] sm:$0xff] %v733_v29  ;;  %v1023_v19 = vmul.f32 %v1022_v27, %v1020_v13  ;;  %vm1034_vm0 = vcmp.lt.s32.totalorder %v1033_v15, 2  ;;  %vm838_vm3 = vcmp.le.f32.partialorder %v837_v23, 0.7853982  ;;  %vm929_vm7 = vweird.f32 %v1926_v40 }
 0x15a   : > { %v900_v12 = vshll.u32 %v899_v54, 30  ;;  %v923_v43 = vsub.s32 4, %v899_v54 }
 0x15b   : > { %v1024_v49 = vxor.u32 2147483648, %v1023_v19 }
 0x15c   : > { %v901_v20 = vsub.s32 %v897_v17, %v900_v12 }
 0x15d   : > { %v1025_v56 = vsel %vm942_vm11, %v1024_v49, %v1023_v19 }
 0x15e   : > { %v1028_v9 = vsel %vm941_vm12, %v1832_v1, %v1025_v56  ;;  %v903_v51 = vsub.s32 0, %v901_v20  ;;  %v924_v1 = vsel %vm839_vm2, %v923_v43, %v899_v54 }
 0x15f   : > { %1280 = vcosq.f32 %v1028_v9  ;;  %v926_v37 = vsel %vm838_vm3, 0, %v924_v1 }
 0x160   : > { %1282 = vsinq.f32 %v1028_v9  ;;  %v1161_v7 = vmin.u32 %v903_v51, %v901_v20  ;;  %v930_v36 = vand.u32 3, %v926_v37 }
 0x162   : > { %v905_v16 = vclz %v1161_v7  ;;  %vm935_vm4 = vcmp.eq.s32.totalorder %v930_v36, 2  ;;  %vm932_vm5 = vcmp.eq.s32.totalorder %v930_v36, 0  ;;  %vm931_vm6 = vcmp.lt.s32.totalorder %v930_v36, 2 }
 0x164   : > { %v1162_v18 = vadd.s32 4294967294, %v905_v16 }
 0x166   : > { %vm1163_vm13 = vcmp.lt.s32.totalorder %v1162_v18, 0 }
 0x167   : > { %v908_v46 = vsel %vm1163_vm13, 0, %v1162_v18 }
 0x168   : > { %v909_v33 = vsub.s32 32, %v908_v46  ;;  %v913_v58 = vsub.s32 4294967266, %v908_v46  ;;  %v910_v8 = vshll.u32 %v901_v20, %v908_v46 }
 0x169   : > { %v1281_v39 = vpop.eup %1280 }
 0x16a   : > { %v1283_v57 = vpop.eup %1282  ;;  %v1039_v28 = vxor.u32 2147483648, %v1281_v39  ;;  %v911_v52 = vshrl.u32 %v893_v38, %v909_v33  ;;  %v914_v24 = vadd.s32 127, %v913_v58 }
 0x16b   : > { %v1036_v0 = vxor.u32 2147483648, %v1283_v57 }
 0x16c   : > { %v1040_v11 = vsel %vm1038_vm14, %v1039_v28, %v1283_v57  ;;  %v912_v47 = vor.u32 %v911_v52, %v910_v8  ;;  %v915_v26 = vshll.u32 %v914_v24, 23 }
 0x16d   : > { %v1037_v25 = vsel %vm1035_vm15, %v1281_v39, %v1036_v0 }
 0x16e   : > { %v1041_v6 = vsel %vm1034_vm0, %v1037_v25, %v1040_v11  ;;  %v916_v30 = vor.u32 4788187, %v915_v26  ;;  %v919_v50 = vcvt.s32.f32 %v912_v47 }
 0x16f   : > { %v1042_v10 = vsel %vm1032_vm1, nan, %v1041_v6 }
 0x170   : > { %1050 = vst [vmem:[%s1717_s4 + $0x38] sm:$0xff] %v1042_v10  ;;  %v917_v44 = vand.u32 2147483647, %v916_v30 }
 0x172   : > { %v920_v42 = vmul.f32 %v919_v50, %v917_v44 }
 0x174   : > { %v921_v32 = vxor.u32 2147483648, %v920_v42 }
 0x176   : > { %v922_v31 = vsel %vm839_vm2, %v921_v32, %v920_v42 }
 0x177   : > { %v925_v35 = vsel %vm838_vm3, %v1926_v40, %v922_v31 }
 0x178   : > { %1284 = vcosq.f32 %v925_v35 }
 0x179   : > { %1286 = vsinq.f32 %v925_v35 }
 0x182   : > { %v1285_v34 = vpop.eup %1284 }
 0x183   : > { %v1287_v62 = vpop.eup %1286  ;;  %v936_v3 = vxor.u32 2147483648, %v1285_v34 }
 0x184   : > { %v933_v59 = vxor.u32 2147483648, %v1287_v62 }
 0x185   : > { %v937_v23 = vsel %vm935_vm4, %v936_v3, %v1287_v62 }
 0x186   : > { %v934_v41 = vsel %vm932_vm5, %v1285_v34, %v933_v59 }
 0x187   : > { %v938_v60 = vsel %vm931_vm6, %v934_v41, %v937_v23 }
 0x188   : > { %v939_v22 = vsel %vm929_vm7, nan, %v938_v60 }
 0x189   : > { %1049 = vst [vmem:[%s1717_s4 + $0x30] sm:$0xff] %v939_v22 }
 0x18a   : > { %1303 = shalt.err (!%p1300_p3)
}
 0x18b   : > { %s1304_s27 = scalar_lea.hbm %s2034_s22, 1024  ;;  %s1308_s30 = scalar_lea.hbm %s2085_s2, 2048 }
 0x18c   : > { %p1305_p4 = scmp.ne.s32.totalorder %s2034_s22, %s1304_s27  ;;  %p1309_p9 = scmp.lt.u32.totalorder %s2034_s22, %s2085_s2 }
 0x18d   : > { %p1310_p10 = scmp.lt.u32.totalorder %s1308_s30, %s1304_s27  ;;  %p1312_p12 = scmp.lt.u32.totalorder %s1304_s27, %s2034_s22 }
 0x18e   : > { %p1306_p7 = pnand %p1305_p4, %p1417_p5 }
 0x18f   : > { %p1311_p11 = por %p1310_p10, %p1309_p9 }
 0x190   : > { %p1307_p8 = pneg %p1306_p7 }
 0x191   : > { %p1313_p13 = por %p1312_p12, %p1311_p11 }
 0x193   : > { %p1314_p0 = pnand %p1313_p13, %p1307_p8 }
 0x195   : > { %1317 = shalt.err (!%p1314_p0)
}
 0x196   : > { %s1362_s5 = smov 128   ;;  %s1363_s6 = smov 8  }
 0x197   : > { %1206 = dma.vmem_to_hbm [thread:$0]  (%p1417_p5), %s2036_s16, 1024, %s2034_s22, %s2042_s13, %s1362_s5, %s1362_s5, %s1363_s6  }
 0x198 PF: > { %p1212_p1 = scmp.ge.s32.totalorder %s1352_s12, 2  ;;  %s1080_s7 = sand.u32 1, %s1340_s9  }
 0x199   : > { %s1081_s8 = scalar_lea.sflag [#allocation3], %s1080_s7 }
 0x19a   : > { %p1209_p2 = pnand %p1212_p1, %p1421_p6 }
 0x19c   : > { %1335 = dma.done.wait (!%p1209_p2), %s1081_s8, 1024  }
 0x19d   : > { %1337 = vsyncadd (!%p1209_p2), %s1081_s8, 4294966272  ;;  %p12_p3 = scmp.ge.s32.totalorder %s1404_s15, 4   ;;  %s2100_s9 = smov %s1344_s10 }
 0x19e   : > { %s2101_s10 = smov %s1348_s11  ;;  %s2102_s11 = smov %s1415_s18 }
 0x19f   : > { %s2103_s12 = smov %s1404_s15  ;;  %14 = sbr.rel (!%p12_p3) target bundleno = 3 (0x3), region = 63 }
 0x1a6   :  { %1086 = vsyncpa [#allocation3], 1 }
 0x1a7   :  { %1088 = vsyncpa [#allocation3 + $0x1], 1 }

</bundles_post_ra>
